<compile_context>
chip_gen: v7x
topology: tpu7x:2x2x1
jax: 0.10.0
libtpu: 0.0.40
codegen_flags: <defaults>
</compile_context>

<pallas_src>
import jax
import jax.numpy as jnp
from jax import lax
from jax.experimental import pallas as pl
from jax.experimental.pallas import tpu as pltpu


def _round_up(x, m):
    return ((x + m - 1) // m) * m


def mlp_value_kernel(x_ref, w1_ref, b1_ref, w2_ref, b2_ref, w3_ref, b3_ref, o_ref):
    # Activation dtype follows the weights: bf16 on the bf16 path, f32 otherwise.
    act_dtype = w2_ref.dtype

    # Layer 1: Linear(input_dim -> hidden) + ReLU.  MXU matmul, f32 accumulation,
    # one cast of the accumulator, then bias + ReLU in the activation dtype (VPU).
    h1 = jnp.dot(x_ref[...], w1_ref[...], preferred_element_type=jnp.float32)
    h1 = jnp.maximum(h1.astype(act_dtype) + b1_ref[...], 0)

    # Layer 2: Linear(hidden -> hidden) + ReLU.
    h2 = jnp.dot(h1, w2_ref[...], preferred_element_type=jnp.float32)
    h2 = jnp.maximum(h2.astype(act_dtype) + b2_ref[...], 0)

    # Layer 3: Linear(hidden -> 1) as a transposed contraction
    # (1, H) . (TILE_M, H)^T -> (1, TILE_M): avoids the wasteful N=1 matmul and
    # the result is lane-dense, so the final store is a full-width vst.
    out_row = lax.dot_general(
        w3_ref[...], h2,
        dimension_numbers=(((1,), (1,)), ((), ())),
        preferred_element_type=jnp.float32)
    o_ref[...] = (out_row + b3_ref[...]).astype(o_ref.dtype)


def mlp_value_forward(x, params, *, tile_m=4096, use_bf16=True, vmem_limit_bytes=None):
    """x: [B, input_dim] float32.  Returns [B, 1] float32."""
    w1, b1, w2, b2, w3, b3 = params
    B, K = x.shape
    H = w1.shape[1]

    # --- Batch tile selection -------------------------------------------------
    # Keep tile_m a multiple of 128 (lane-dense output row) and cap it at
    # round_up(ceil(B/2), 128) so that:
    #   * small batches never over-allocate (tile shrinks to 128), and
    #   * there are >= 2 grid steps whenever B > 128, keeping both of v7x's
    #     TensorCores busy under dimension_semantics=("parallel",).
    tile_m = _round_up(max(int(tile_m), 128), 128)
    tile_cap = max(128, _round_up(-(-B // 2), 128))
    tile_m = min(tile_m, tile_cap)
    num_tiles = pl.cdiv(B, tile_m)

    # --- Dtype selection ------------------------------------------------------
    mm_dtype = jnp.bfloat16 if use_bf16 else jnp.float32
    x_in = x.astype(mm_dtype)
    w1_in = w1.astype(mm_dtype)
    b1_in = b1.astype(mm_dtype)
    w2_in = w2.astype(mm_dtype)
    b2_in = b2.astype(mm_dtype)
    w3_in = w3.reshape(1, H).astype(mm_dtype)   # head weight as a (1, H) row
    b3_in = b3.reshape(1, 1).astype(jnp.float32)  # head bias stays f32

    # --- Compiler params ------------------------------------------------------
    cp_kwargs = dict(dimension_semantics=("parallel",))
    if vmem_limit_bytes is None and tile_m > 4096:
        # Rough working-set estimate (double-buffered x + out, f32 h1/h2 temps,
        # resident weights) with ~1.5x headroom; only needed for very large
        # tiles, which would otherwise trip v5e's 16 MiB default scoped limit.
        x_bytes = jnp.dtype(mm_dtype).itemsize
        est = (2 * tile_m * K * x_bytes
               + 2 * tile_m * 4
               + 4 * tile_m * H * 4
               + (K * H + H * H + 3 * H + 1) * 4)
        vmem_limit_bytes = min(int(est * 1.5) + (4 << 20), 64 << 20)
    if vmem_limit_bytes is not None:
        cp_kwargs["vmem_limit_bytes"] = int(vmem_limit_bytes)
    compiler_params = pltpu.CompilerParams(**cp_kwargs)

    # Weights / biases: constant index_map -> fetched once, VMEM-resident.
    resident = lambda shape: pl.BlockSpec(shape, lambda i: (0,) * len(shape))

    out = pl.pallas_call(
        mlp_value_kernel,
        out_shape=jax.ShapeDtypeStruct((1, B), jnp.float32),
        grid=(num_tiles,),
        in_specs=[
            pl.BlockSpec((tile_m, K), lambda i: (i, 0)),   # x: streamed over batch
            resident((K, H)),                               # w1
            resident((1, H)),                               # b1
            resident((H, H)),                               # w2
            resident((1, H)),                               # b2
            resident((1, H)),                               # w3 (as a row)
            resident((1, 1)),                               # b3
        ],
        out_specs=pl.BlockSpec((1, tile_m), lambda i: (0, i)),  # lane-dense row
        compiler_params=compiler_params,
    )(x_in, w1_in, b1_in, w2_in, b2_in, w3_in, b3_in)

    # (1, B) lane-dense slab -> [B, 1] like nn.Linear(hidden, 1).
    return out.reshape(B, 1)


def init_params(key, input_dim, hidden_dim=128):
    """PyTorch nn.Linear-style init: U(-1/sqrt(fan_in), +1/sqrt(fan_in))."""
    ks = jax.random.split(key, 6)

    def linear(kw, kb, fan_in, fan_out):
        bound = 1.0 / jnp.sqrt(fan_in)
        w = jax.random.uniform(kw, (fan_in, fan_out), jnp.float32, -bound, bound)
        b = jax.random.uniform(kb, (1, fan_out), jnp.float32, -bound, bound)
        return w, b

    w1, b1 = linear(ks[0], ks[1], input_dim, hidden_dim)
    w2, b2 = linear(ks[2], ks[3], hidden_dim, hidden_dim)
    w3, b3 = linear(ks[4], ks[5], hidden_dim, 1)
    return (w1, b1, w2, b2, w3, b3)


def _reference(x, params):
    w1, b1, w2, b2, w3, b3 = params
    h = jnp.maximum(x @ w1 + b1, 0.0)
    h = jnp.maximum(h @ w2 + b2, 0.0)
    return h @ w3 + b3


if __name__ == "__main__":
    key = jax.random.PRNGKey(0)
    k_x, k_p = jax.random.split(key)

    batch, input_dim, hidden_dim = 8, 16, 128
    x = jax.random.normal(k_x, (batch, input_dim), jnp.float32)
    params = init_params(k_p, input_dim, hidden_dim)
    ref = _reference(x, params)

    # f32 path: exact parity with the PyTorch module.
    out_f32 = mlp_value_forward(x, params, use_bf16=False)
    jax.block_until_ready(out_f32)
    assert out_f32.shape == (batch, 1)
    assert jnp.allclose(out_f32, ref, atol=1e-5, rtol=1e-5)

    # Default bf16 matmul path: reduced input/activation precision, f32 accumulation.
    out_bf16 = mlp_value_forward(x, params)
    jax.block_until_ready(out_bf16)
    assert out_bf16.shape == (batch, 1)
    assert jnp.allclose(out_bf16, ref, atol=5e-2, rtol=5e-2)

    # Multi-tile ragged batch: exercises the pipelined grid, the >=2-step tile
    # cap (two tiles of 512 here), and partial-block handling with NO wrapper pad.
    xb = jax.random.normal(jax.random.PRNGKey(1), (1000, input_dim), jnp.float32)
    out_big = mlp_value_forward(xb, params, use_bf16=False)
    jax.block_until_ready(out_big)
    ref_big = _reference(xb, params)
    assert out_big.shape == (1000, 1)
    assert jnp.allclose(out_big, ref_big, atol=1e-4, rtol=1e-4)

    # Same ragged batch on the default bf16 path.
    out_big_bf16 = mlp_value_forward(xb, params)
    jax.block_until_ready(out_big_bf16)
    assert jnp.allclose(out_big_bf16, ref_big, atol=5e-2, rtol=5e-2)

    print("KERNEL_OK")
</pallas_src>

<mosaic_0001>
module attributes {stable_mosaic.version = 11 : i64} {
  func.func @mlp_value_kernel(%arg0: i32, %arg1: memref<128x16xf32, #tpu.memory_space<vmem>>, %arg2: memref<16x128xf32, #tpu.memory_space<vmem>>, %arg3: memref<1x128xf32, #tpu.memory_space<vmem>>, %arg4: memref<128x128xf32, #tpu.memory_space<vmem>>, %arg5: memref<1x128xf32, #tpu.memory_space<vmem>>, %arg6: memref<1x128xf32, #tpu.memory_space<vmem>>, %arg7: memref<1x1xf32, #tpu.memory_space<vmem>>, %arg8: memref<1x128xf32, #tpu.memory_space<vmem>>) attributes {dimension_semantics = [#tpu.dimension_semantics<parallel>], iteration_bounds = array<i64: 1>, scalar_prefetch = 0 : i64, scratch_operands = 0 : i64, tpu.core_type = #tpu.core_type<tc>, window_params = [{transform_indices = @transform_0, window_bounds = array<i64: 128, 16>}, {pipeline_mode = #tpu.pipeline_mode<synchronous>, transform_indices = @transform_1, window_bounds = array<i64: 16, 128>}, {pipeline_mode = #tpu.pipeline_mode<synchronous>, transform_indices = @transform_2, window_bounds = array<i64: 1, 128>}, {pipeline_mode = #tpu.pipeline_mode<synchronous>, transform_indices = @transform_3, window_bounds = array<i64: 128, 128>}, {pipeline_mode = #tpu.pipeline_mode<synchronous>, transform_indices = @transform_4, window_bounds = array<i64: 1, 128>}, {pipeline_mode = #tpu.pipeline_mode<synchronous>, transform_indices = @transform_5, window_bounds = array<i64: 1, 128>}, {pipeline_mode = #tpu.pipeline_mode<synchronous>, transform_indices = @transform_6, window_bounds = array<i64: 1, 1>}, {transform_indices = @transform_7, window_bounds = array<i64: 1, 128>}]} {
    %c0 = arith.constant 0 : index
    %c0_0 = arith.constant 0 : index
    %0 = vector.load %arg1[%c0, %c0_0] : memref<128x16xf32, #tpu.memory_space<vmem>>, vector<128x16xf32>
    %c0_1 = arith.constant 0 : index
    %c0_2 = arith.constant 0 : index
    %1 = vector.load %arg2[%c0_1, %c0_2] : memref<16x128xf32, #tpu.memory_space<vmem>>, vector<16x128xf32>
    %cst = arith.constant dense<0.000000e+00> : vector<128x128xf32>
    %2 = tpu.matmul %0, %1, %cst {dimension_numbers = #tpu.dot_dimension_numbers<[1], [0], [0], [1], [0, 0, 1, 1], [], []>} : vector<128x16xf32>, vector<16x128xf32>, vector<128x128xf32> -> vector<128x128xf32>
    %c0_3 = arith.constant 0 : index
    %c0_4 = arith.constant 0 : index
    %3 = vector.load %arg3[%c0_3, %c0_4] : memref<1x128xf32, #tpu.memory_space<vmem>>, vector<1x128xf32>
    %4 = vector.broadcast %3 : vector<1x128xf32> to vector<128x128xf32>
    %5 = arith.addf %2, %4 : vector<128x128xf32>
    %cst_5 = arith.constant 0.000000e+00 : f32
    %6 = vector.broadcast %cst_5 : f32 to vector<128x128xf32>
    %7 = arith.maximumf %5, %6 : vector<128x128xf32>
    %c0_6 = arith.constant 0 : index
    %c0_7 = arith.constant 0 : index
    %8 = vector.load %arg4[%c0_6, %c0_7] : memref<128x128xf32, #tpu.memory_space<vmem>>, vector<128x128xf32>
    %cst_8 = arith.constant dense<0.000000e+00> : vector<128x128xf32>
    %9 = tpu.matmul %7, %8, %cst_8 {dimension_numbers = #tpu.dot_dimension_numbers<[1], [0], [0], [1], [0, 0, 1, 1], [], []>} : vector<128x128xf32>, vector<128x128xf32>, vector<128x128xf32> -> vector<128x128xf32>
    %c0_9 = arith.constant 0 : index
    %c0_10 = arith.constant 0 : index
    %10 = vector.load %arg5[%c0_9, %c0_10] : memref<1x128xf32, #tpu.memory_space<vmem>>, vector<1x128xf32>
    %11 = vector.broadcast %10 : vector<1x128xf32> to vector<128x128xf32>
    %12 = arith.addf %9, %11 : vector<128x128xf32>
    %cst_11 = arith.constant 0.000000e+00 : f32
    %13 = vector.broadcast %cst_11 : f32 to vector<128x128xf32>
    %14 = arith.maximumf %12, %13 : vector<128x128xf32>
    %c0_12 = arith.constant 0 : index
    %c0_13 = arith.constant 0 : index
    %15 = vector.load %arg6[%c0_12, %c0_13] : memref<1x128xf32, #tpu.memory_space<vmem>>, vector<1x128xf32>
    %cst_14 = arith.constant dense<0.000000e+00> : vector<1x128xf32>
    %16 = tpu.matmul %15, %14, %cst_14 {dimension_numbers = #tpu.dot_dimension_numbers<[1], [1], [0], [0], [0, 0, 1, 0], [], []>} : vector<1x128xf32>, vector<128x128xf32>, vector<1x128xf32> -> vector<1x128xf32>
    %c0_15 = arith.constant 0 : index
    %c0_16 = arith.constant 0 : index
    %17 = vector.load %arg7[%c0_15, %c0_16] : memref<1x1xf32, #tpu.memory_space<vmem>>, vector<1x1xf32>
    %18 = vector.broadcast %17 : vector<1x1xf32> to vector<1x128xf32>
    %19 = arith.addf %16, %18 : vector<1x128xf32>
    %c0_17 = arith.constant 0 : index
    %c0_18 = arith.constant 0 : index
    %20 = vector.load %arg8[%c0_17, %c0_18] : memref<1x128xf32, #tpu.memory_space<vmem>>, vector<1x128xf32>
    tpu.vector_store %arg8[%c0_17, %c0_18], %19 {strides = array<i32>} : memref<1x128xf32, #tpu.memory_space<vmem>>, vector<1x128xf32>,
    return
  }
  func.func @transform_0(%arg0: i32) -> (i32, i32) {
    %c0_i32 = arith.constant 0 : i32
    %c0_i32_0 = arith.constant 0 : i32
    return %arg0, %c0_i32 : i32, i32
  }
  func.func @transform_1(%arg0: i32) -> (i32, i32) {
    %c0_i32 = arith.constant 0 : i32
    %c0_i32_0 = arith.constant 0 : i32
    %c0_i32_1 = arith.constant 0 : i32
    return %c0_i32, %c0_i32_0 : i32, i32
  }
  func.func @transform_2(%arg0: i32) -> (i32, i32) {
    %c0_i32 = arith.constant 0 : i32
    %c0_i32_0 = arith.constant 0 : i32
    %c0_i32_1 = arith.constant 0 : i32
    return %c0_i32, %c0_i32_0 : i32, i32
  }
  func.func @transform_3(%arg0: i32) -> (i32, i32) {
    %c0_i32 = arith.constant 0 : i32
    %c0_i32_0 = arith.constant 0 : i32
    %c0_i32_1 = arith.constant 0 : i32
    return %c0_i32, %c0_i32_0 : i32, i32
  }
  func.func @transform_4(%arg0: i32) -> (i32, i32) {
    %c0_i32 = arith.constant 0 : i32
    %c0_i32_0 = arith.constant 0 : i32
    %c0_i32_1 = arith.constant 0 : i32
    return %c0_i32, %c0_i32_0 : i32, i32
  }
  func.func @transform_5(%arg0: i32) -> (i32, i32) {
    %c0_i32 = arith.constant 0 : i32
    %c0_i32_0 = arith.constant 0 : i32
    %c0_i32_1 = arith.constant 0 : i32
    return %c0_i32, %c0_i32_0 : i32, i32
  }
  func.func @transform_6(%arg0: i32) -> (i32, i32) {
    %c0_i32 = arith.constant 0 : i32
    %c0_i32_0 = arith.constant 0 : i32
    %c0_i32_1 = arith.constant 0 : i32
    return %c0_i32, %c0_i32_0 : i32, i32
  }
  func.func @transform_7(%arg0: i32) -> (i32, i32) {
    %c0_i32 = arith.constant 0 : i32
    %c0_i32_0 = arith.constant 0 : i32
    return %c0_i32, %arg0 : i32, i32
  }
}

</mosaic_0001>

<bundles_post_ra>
// kernel: tpu_custom_call.1
= control target key start
LH: loop header
LB: loop body
LE: loop exit
PB: predicated region body
PF: predicated region fallthrough
CT: control target
= control target key end

     0   :  { %s1107_s0 = inlined_call_operand.hbm [shape: f32[8,16], index: 0, kind: input, shape index: {}]   ;;  %s1108_s1 = inlined_call_operand.hbm [shape: f32[16,128], index: 1, kind: input, shape index: {}]   ;;  %s1109_s2 = inlined_call_operand.vmem [shape: f32[1,128], index: 2, kind: input, shape index: {}]   ;;  %s1110_s3 = inlined_call_operand.hbm [shape: f32[128,128], index: 3, kind: input, shape index: {}]   ;;  %s1111_s4 = inlined_call_operand.vmem [shape: f32[1,128], index: 4, kind: input, shape index: {}]   ;;  %s1112_s5 = inlined_call_operand.vmem [shape: f32[1,128], index: 5, kind: input, shape index: {}]   ;;  %s1113_s6 = inlined_call_operand.<no memory space> [shape: f32[1,1], index: 6, kind: input, shape index: {}]   ;;  %s1114_s7 = inlined_call_operand.hbm [shape: f32[1,8], index: 7, kind: output, shape index: {}]  }
   0x1   :  { %v12_v0 = vstv %s1113_s6 }
   0x2   :  { %13 = vst [vmem:[#allocation2] sm:$0x1] %v12_v0 }
   0x3   :  { %14 = vsyncpa [#allocation4], 0 }
   0x4   :  { %15 = vsyncpa [#allocation7], 0 }
   0x5   :  { %16 = vsyncpa [#allocation5], 0 }
   0x6   :  { %21 = vsyncadd [#allocation4], 1920  ;;  %s956_s26 = smov [#allocation6]   ;;  %s957_s28 = smov [#allocation3]  }
   0x7   :  { %s34_s27 = sshll.u32 %s956_s26, 4  ;;  %s22_s29 = sshll.u32 %s957_s28, 4  ;;  %s35_s27 = int_to_ptr.vmem [resolvable:$true] %s34_s27  ;;  %s1009_s29 = int_to_ptr.vmem [resolvable:$true] %s22_s29 }
   0x8   :  { %s862_s9 = scalar_lea.hbm %s1108_s1, 256 }
   0x9   :  { %p863_p0 = scmp.ne.s32.totalorder %s1108_s1, %s862_s9  ;;  %p866_p1 = scmp.lt.u32.totalorder %s862_s9, %s1108_s1 }
   0xb   :  { %p868_p2 = pnand %p866_p1, %p863_p0 }
   0xd   :  { %871 = shalt.err (!%p868_p2)
}
   0xe   :  { %s872_s13 = scalar_lea.vmem %s35_s27, 256  ;;  %p877_p4 = scmp.lt.s32.totalorder %s35_s27, %s35_s27 }
   0xf   :  { %p873_p3 = scmp.ne.s32.totalorder %s35_s27, %s872_s13  ;;  %p878_p5 = scmp.lt.s32.totalorder %s872_s13, %s872_s13 }
  0x11   :  { %p879_p6 = por %p878_p5, %p877_p4 }
  0x13   :  { %p880_p7 = pnand %p879_p6, %p873_p3 }
  0x15   :  { %883 = shalt.err (!%p880_p7)
}
  0x16   :  { %s958_s14 = smov 128   ;;  %s959_s15 = smov 8  }
  0x17   :  { %40 = dma.hbm_to_vmem [thread:$0]  %s1108_s1, 256, %s35_s27, [#allocation7], %s958_s14, %s958_s14, %s959_s15  }
  0x18   :  { %s884_s20 = scalar_lea.hbm %s1107_s0, 128 }
  0x19   :  { %p885_p8 = scmp.ne.s32.totalorder %s1107_s0, %s884_s20  ;;  %p888_p9 = scmp.lt.u32.totalorder %s884_s20, %s1107_s0 }
  0x1b   :  { %p890_p10 = pnand %p888_p9, %p885_p8 }
  0x1d   :  { %893 = shalt.err (!%p890_p10)
}
  0x1e   :  { %s894_s25 = scalar_lea.vmem %s1009_s29, 128  ;;  %s898_s1 = scalar_lea.vmem %s1009_s29, 2048 }
  0x1f   :  { %p895_p11 = scmp.ne.s32.totalorder %s1009_s29, %s894_s25  ;;  %p899_p12 = scmp.lt.s32.totalorder %s1009_s29, %s1009_s29 }
  0x20   :  { %p900_p13 = scmp.lt.s32.totalorder %s898_s1, %s894_s25 }
  0x22   :  { %p901_p0 = por %p900_p13, %p899_p12 }
  0x24   :  { %p902_p1 = pnand %p901_p0, %p895_p11 }
  0x26   :  { %905 = shalt.err (!%p902_p1)
}
  0x27   :  { %28 = dma.hbm_to_vmem [thread:$0]  %s1107_s0, 128, %s1009_s29, [#allocation4], %s958_s14, %s958_s14, %s959_s15  }
  0x28   :  { %s960_s28 = smov [#allocation8]   ;;  %s906_s10 = scalar_lea.hbm %s1110_s3, 2048 }
  0x29   :  { %s48_s30 = sshll.u32 %s960_s28, 4  ;;  %p907_p2 = scmp.ne.s32.totalorder %s1110_s3, %s906_s10  ;;  %s49_s30 = int_to_ptr.vmem [resolvable:$true] %s48_s30 }
  0x2a   :  { %p910_p3 = scmp.lt.u32.totalorder %s906_s10, %s1110_s3 }
  0x2c   :  { %p912_p4 = pnand %p910_p3, %p907_p2 }
  0x2e   :  { %915 = shalt.err (!%p912_p4)
}
  0x2f   :  { %s916_s16 = scalar_lea.vmem %s49_s30, 2048  ;;  %p921_p6 = scmp.lt.s32.totalorder %s49_s30, %s49_s30 }
  0x30   :  { %p917_p5 = scmp.ne.s32.totalorder %s49_s30, %s916_s16  ;;  %p922_p7 = scmp.lt.s32.totalorder %s916_s16, %s916_s16 }
  0x32   :  { %p923_p8 = por %p922_p7, %p921_p6 }
  0x34   :  { %p924_p9 = pnand %p923_p8, %p917_p5 }
  0x36   :  { %927 = shalt.err (!%p924_p9)
}
  0x37   :  { %54 = dma.hbm_to_vmem [thread:$0]  %s1110_s3, 2048, %s49_s30, [#allocation7], %s958_s14, %s958_s14, %s959_s15  }
  0x38   :  { %950 = dma.done.wait [#allocation4], 2048  }
  0x39   :  { %951 = vsyncadd [#allocation4], 4294965248 }
  0x3a   :  { %952 = dma.done.wait [#allocation7], 2304  }
  0x3b   :  { %953 = vsyncadd [#allocation7], 4294964992  ;;  %vm95_vm0 = vcmask 130048   ;;  %v86_v1 = vld [vmem:[#allocation6] sm:$0xff]  ;;  %v87_v2 = vld [vmem:[#allocation6 + $0x8] sm:$0xff]  ;;  %vm962_vm1 = vmmov 0  }
  0x3c   :  { %v70_v3 = vld [vmem:[#allocation3] sm:$0xff]  ;;  %v791_v4 = vpack.c.bf16 %v87_v2, %v86_v1  ;;  %v71_v5 = vld [vmem:[#allocation3 + $0x8] sm:$0xff]  ;;  %v72_v6 = vld [vmem:[#allocation3 + $0x10] sm:$0xff]  ;;  %s965_s18 = smov [#allocation9]  }
  0x3d   :  { %676 = vmatprep.mubr.msk.f32.mxu1 %vm95_vm0, %v70_v3  ;;  %v305_v7 = vld [vmem:[#allocation8] sm:$0xff]  ;;  %v306_v8 = vld [vmem:[#allocation8 + $0x8] sm:$0xff]  ;;  %v307_v9 = vld [vmem:[#allocation8 + $0x10] sm:$0xff]  ;;  %s577_s19 = sshll.u32 %s965_s18, 4  ;;  %s578_s19 = int_to_ptr.vmem [resolvable:$true] %s577_s19 }
  0x3e   :  { %792 = vmatprep.subr.bf16.mxu1 %v791_v4  ;;  %v795_v10 = vpack.c.bf16 %v306_v8, %v305_v7  ;;  %v308_v11 = vld [vmem:[#allocation8 + $0x18] sm:$0xff]  ;;  %v73_v12 = vld [vmem:[#allocation3 + $0x18] sm:$0xff]  ;;  %v309_v14 = vld [vmem:[#allocation8 + $0x20] sm:$0xff]  ;;  %s928_s20 = scalar_lea.vmem %s578_s19, 16  ;;  %s932_s21 = scalar_lea.vmem %s578_s19, 32 }
  0x3f   :  { %794 = vmatpush3.bf16.msra.mxu1 %v791_v4  ;;  %v799_v13 = vpack.c.bf16 %v308_v11, %v307_v9  ;;  %v310_v15 = vld [vmem:[#allocation8 + $0x28] sm:$0xff]  ;;  %v74_v16 = vld [vmem:[#allocation3 + $0x20] sm:$0xff]  ;;  %v75_v18 = vld [vmem:[#allocation3 + $0x28] sm:$0xff]  ;;  %p929_p10 = scmp.ne.s32.totalorder %s578_s19, %s928_s20  ;;  %p933_p11 = scmp.lt.s32.totalorder %s578_s19, %s578_s19 }
  0x40   :  { %796 = vmatprep.subr.bf16.mxu1 %v795_v10  ;;  %v803_v17 = vpack.c.bf16 %v310_v15, %v309_v14  ;;  %v311_v19 = vld [vmem:[#allocation8 + $0x30] sm:$0xff]  ;;  %v312_v20 = vld [vmem:[#allocation8 + $0x38] sm:$0xff]  ;;  %v76_v21 = vld [vmem:[#allocation3 + $0x30] sm:$0xff]  ;;  %p934_p12 = scmp.lt.s32.totalorder %s932_s21, %s928_s20 }
  0x41   :  { %v807_v22 = vpack.c.bf16 %v312_v20, %v311_v19  ;;  %v77_v23 = vld [vmem:[#allocation3 + $0x38] sm:$0xff]  ;;  %v313_v24 = vld [vmem:[#allocation8 + $0x40] sm:$0xff]  ;;  %v78_v26 = vld [vmem:[#allocation3 + $0x40] sm:$0xff] }
  0x42   :  { %677 = vmatmul.mubr.msk.f32.vlgmr.msra.gmra.mrb[0].mxu1 %vm95_vm0, %v71_v5  ;;  %v314_v25 = vld [vmem:[#allocation8 + $0x48] sm:$0xff]  ;;  %v79_v28 = vld [vmem:[#allocation3 + $0x48] sm:$0xff]  ;;  %v315_v29 = vld [vmem:[#allocation8 + $0x50] sm:$0xff]  ;;  %p935_p13 = por %p934_p12, %p933_p11 }
  0x43   :  { %679 = vmatprep.mubr.msk.f32.mxu1 %vm95_vm0, %v72_v6  ;;  %798 = vmatpush3.bf16.msra.mxu1 %v795_v10  ;;  %v811_v27 = vpack.c.bf16 %v314_v25, %v313_v24  ;;  %v316_v30 = vld [vmem:[#allocation8 + $0x58] sm:$0xff]  ;;  %v80_v31 = vld [vmem:[#allocation3 + $0x50] sm:$0xff]  ;;  %v81_v33 = vld [vmem:[#allocation3 + $0x58] sm:$0xff] }
  0x44   :  { %800 = vmatprep.subr.bf16.mxu1 %v799_v13  ;;  %v815_v32 = vpack.c.bf16 %v316_v30, %v315_v29  ;;  %v317_v34 = vld [vmem:[#allocation8 + $0x60] sm:$0xff]  ;;  %v318_v35 = vld [vmem:[#allocation8 + $0x68] sm:$0xff]  ;;  %v82_v36 = vld [vmem:[#allocation3 + $0x60] sm:$0xff]  ;;  %v961_v29 = vmov 0.0|0.0   ;;  %v963_v30 = vmov 0.0   ;;  %p936_p0 = pnand %p935_p13, %p929_p10 }
  0x45   :  { %v819_v37 = vpack.c.bf16 %v318_v35, %v317_v34  ;;  %v83_v38 = vld [vmem:[#allocation3 + $0x68] sm:$0xff]  ;;  %v84_v39 = vld [vmem:[#allocation3 + $0x70] sm:$0xff]  ;;  %v85_v40 = vld [vmem:[#allocation3 + $0x78] sm:$0xff]  ;;  %827 = vmatprep.subr.bf16.mxu0 %v961_v29  ;;  %788 = vmatprep.mubr.msk.f32.mxu0 %vm962_vm1, %v963_v30 }
  0x46   :  { %680 = vmatmul.mubr.msk.f32.gmra.mrb[2].mxu1 %vm95_vm0, %v73_v12  ;;  %v319_v41 = vld [vmem:[#allocation8 + $0x70] sm:$0xff]  ;;  %v320_v42 = vld [vmem:[#allocation8 + $0x78] sm:$0xff]  ;;  %v587_v44 = vld [vmem:[%s1109_s2] ss:$0 sm:$0xff] }
  0x47   :  { %682 = vmatprep.mubr.msk.f32.mxu1 %vm95_vm0, %v74_v16  ;;  %802 = vmatpush3.bf16.msra.mxu1 %v799_v13  ;;  %v823_v43 = vpack.c.bf16 %v320_v42, %v319_v41 }
  0x48   :  { %804 = vmatprep.subr.bf16.mxu1 %v803_v17 }
  0x4a   :  { %683 = vmatmul.mubr.msk.f32.gmra.mrb[4].mxu1 %vm95_vm0, %v75_v18 }
  0x4b   :  { %685 = vmatprep.mubr.msk.f32.mxu1 %vm95_vm0, %v76_v21  ;;  %806 = vmatpush3.bf16.msra.mxu1 %v803_v17 }
  0x4c   :  { %808 = vmatprep.subr.bf16.mxu1 %v807_v22 }
  0x4e   :  { %686 = vmatmul.mubr.msk.f32.gmra.mrb[6].mxu1 %vm95_vm0, %v77_v23 }
  0x4f   :  { %688 = vmatprep.mubr.msk.f32.mxu1 %vm95_vm0, %v78_v26  ;;  %810 = vmatpush3.bf16.msra.mxu1 %v807_v22 }
  0x50   :  { %812 = vmatprep.subr.bf16.mxu1 %v811_v27 }
  0x52   :  { %689 = vmatmul.mubr.msk.f32.gmra.mrb[8].mxu1 %vm95_vm0, %v79_v28 }
  0x53   :  { %691 = vmatprep.mubr.msk.f32.mxu1 %vm95_vm0, %v80_v31  ;;  %814 = vmatpush3.bf16.msra.mxu1 %v811_v27  ;;  %v490_v31 = vld [vmem:[#allocation2] sm:$0x1] }
  0x54   :  { %816 = vmatprep.subr.bf16.mxu1 %v815_v32 }
  0x56   :  { %692 = vmatmul.mubr.msk.f32.gmra.mrb[10].mxu1 %vm95_vm0, %v81_v33  ;;  %v604_v33 = vld [vmem:[%s1111_s4] ss:$0 sm:$0xff] }
  0x57   :  { %694 = vmatprep.mubr.msk.f32.mxu1 %vm95_vm0, %v82_v36  ;;  %818 = vmatpush3.bf16.msra.mxu1 %v815_v32  ;;  %v964_v32 = vmov 0  }
  0x58   :  { %820 = vmatprep.subr.bf16.mxu1 %v819_v37  ;;  %861 = vset.pattern.permute.xlu0 %v964_v32 }
  0x59   :  { %493 = vperm.xlu0 %861, %v490_v31  }
  0x5a   :  { %695 = vmatmul.mubr.msk.f32.gmra.mrb[12].mxu1 %vm95_vm0, %v83_v38 }
  0x5b   :  { %697 = vmatprep.mubr.msk.f32.mxu1 %vm95_vm0, %v84_v39  ;;  %822 = vmatpush3.bf16.msra.mxu1 %v819_v37 }
  0x5c   :  { %824 = vmatprep.subr.bf16.mxu1 %v823_v43 }
  0x5e   :  { %698 = vmatmul.mubr.msk.f32.gmra.mrb[14].mxu1 %vm95_vm0, %v85_v40 }
  0x5f   :  { %826 = vmatpush3.bf16.msra.mxu1 %v823_v43 }
  0xd8   :  { %v494_v31 = vpop.permute.xlu0 %493 }
 0x115   :  { %v678_v45 = vpop.f32.mrb[0].mxu1 }
 0x116   :  { %v216_v46 = vadd.f32 %v678_v45, %v587_v44  ;;  %v210_v47 = vpop.f32.mrb[1].mxu1 }
 0x117   :  { %v211_v48 = vadd.f32 %v587_v44, %v210_v47 }
 0x118   :  { %v290_v51 = vmax.f32 %v216_v46, 0.0 }
 0x119   :  { %v289_v49 = vmax.f32 %v211_v48, 0.0  ;;  %v681_v50 = vpop.f32.mrb[2].mxu1 }
 0x11a   :  { %v226_v52 = vadd.f32 %v681_v50, %v587_v44  ;;  %v220_v53 = vpop.f32.mrb[3].mxu1 }
 0x11b   :  { %v221_v54 = vadd.f32 %v587_v44, %v220_v53  ;;  %732 = vmatprep.mubr.f32.mxu1 %v289_v49 }
 0x11c   :  { %v292_v55 = vmax.f32 %v226_v52, 0.0  ;;  %733 = vmatmul.mubr.f32.vlgmr.msra.gmra.mrb[16].mxu1 %v290_v51 }
 0x11d   :  { %v291_v56 = vmax.f32 %v221_v54, 0.0  ;;  %v684_v57 = vpop.f32.mrb[4].mxu1 }
 0x11e   :  { %v236_v58 = vadd.f32 %v684_v57, %v587_v44  ;;  %v230_v59 = vpop.f32.mrb[5].mxu1 }
 0x11f   :  { %735 = vmatprep.mubr.f32.mxu1 %v291_v56  ;;  %v231_v60 = vadd.f32 %v587_v44, %v230_v59 }
 0x120   :  { %736 = vmatmul.mubr.f32.gmra.mrb[18].mxu1 %v292_v55  ;;  %v294_v61 = vmax.f32 %v236_v58, 0.0 }
 0x121   :  { %v293_v62 = vmax.f32 %v231_v60, 0.0  ;;  %v687_v63 = vpop.f32.mrb[6].mxu1 }
 0x122   :  { %v246_v0 = vadd.f32 %v687_v63, %v587_v44  ;;  %v240_v1 = vpop.f32.mrb[7].mxu1 }
 0x123   :  { %738 = vmatprep.mubr.f32.mxu1 %v293_v62  ;;  %v241_v2 = vadd.f32 %v587_v44, %v240_v1 }
 0x124   :  { %739 = vmatmul.mubr.f32.gmra.mrb[20].mxu1 %v294_v61  ;;  %v296_v3 = vmax.f32 %v246_v0, 0.0 }
 0x125   :  { %v295_v4 = vmax.f32 %v241_v2, 0.0  ;;  %v690_v5 = vpop.f32.mrb[8].mxu1 }
 0x126   :  { %v256_v6 = vadd.f32 %v690_v5, %v587_v44  ;;  %v250_v7 = vpop.f32.mrb[9].mxu1 }
 0x127   :  { %741 = vmatprep.mubr.f32.mxu1 %v295_v4  ;;  %v251_v8 = vadd.f32 %v587_v44, %v250_v7 }
 0x128   :  { %742 = vmatmul.mubr.f32.gmra.mrb[22].mxu1 %v296_v3  ;;  %v298_v9 = vmax.f32 %v256_v6, 0.0 }
 0x129   :  { %v297_v10 = vmax.f32 %v251_v8, 0.0  ;;  %v693_v11 = vpop.f32.mrb[10].mxu1 }
 0x12a   :  { %v266_v12 = vadd.f32 %v693_v11, %v587_v44  ;;  %v260_v13 = vpop.f32.mrb[11].mxu1 }
 0x12b   :  { %744 = vmatprep.mubr.f32.mxu1 %v297_v10  ;;  %v261_v14 = vadd.f32 %v587_v44, %v260_v13 }
 0x12c   :  { %745 = vmatmul.mubr.f32.gmra.mrb[24].mxu1 %v298_v9  ;;  %v300_v15 = vmax.f32 %v266_v12, 0.0 }
 0x12d   :  { %v299_v16 = vmax.f32 %v261_v14, 0.0  ;;  %v696_v17 = vpop.f32.mrb[12].mxu1 }
 0x12e   :  { %v276_v18 = vadd.f32 %v696_v17, %v587_v44  ;;  %v270_v19 = vpop.f32.mrb[13].mxu1 }
 0x12f   :  { %747 = vmatprep.mubr.f32.mxu1 %v299_v16  ;;  %v271_v20 = vadd.f32 %v587_v44, %v270_v19 }
 0x130   :  { %748 = vmatmul.mubr.f32.gmra.mrb[26].mxu1 %v300_v15  ;;  %v302_v21 = vmax.f32 %v276_v18, 0.0 }
 0x131   :  { %v301_v22 = vmax.f32 %v271_v20, 0.0  ;;  %v699_v23 = vpop.f32.mrb[14].mxu1 }
 0x132   :  { %v286_v24 = vadd.f32 %v699_v23, %v587_v44  ;;  %v280_v25 = vpop.f32.mrb[15].mxu1 }
 0x133   :  { %750 = vmatprep.mubr.f32.mxu1 %v301_v22  ;;  %v281_v26 = vadd.f32 %v587_v44, %v280_v25 }
 0x134   :  { %751 = vmatmul.mubr.f32.gmra.mrb[28].mxu1 %v302_v21  ;;  %v304_v27 = vmax.f32 %v286_v24, 0.0 }
 0x135   :  { %v303_v28 = vmax.f32 %v281_v26, 0.0  ;;  %v489_v26 = vld [vmem:[%s1112_s5] sm:$0x1] }
 0x137   :  { %753 = vmatprep.mubr.f32.mxu1 %v303_v28 }
 0x138   :  { %754 = vmatmul.mubr.f32.gmra.mrb[30].mxu1 %v304_v27  ;;  %v496_v27 = vlaneseq }
 0x13a   :  { %v497_v28 = vshrl.u32 %v496_v27, 7 }
 0x13c   :  { %v498_v30 = vsub.s32 0, %v497_v28 }
 0x13e   :  { %v499_v32 = vrot.slane %v494_v31, %v498_v30 }
 0x1ef   :  { %v734_v34 = vpop.f32.mrb[16].mxu1 }
 0x1f0   :  { %v400_v35 = vadd.f32 %v734_v34, %v604_v33  ;;  %v394_v36 = vpop.f32.mrb[17].mxu1 }
 0x1f1   :  { %v395_v37 = vadd.f32 %v604_v33, %v394_v36 }
 0x1f2   :  { %v474_v38 = vmax.f32 %v400_v35, 0.0 }
 0x1f3   :  { %v473_v39 = vmax.f32 %v395_v37, 0.0  ;;  %v737_v40 = vpop.f32.mrb[18].mxu1 }
 0x1f4   :  { %v410_v41 = vadd.f32 %v737_v40, %v604_v33  ;;  %v404_v42 = vpop.f32.mrb[19].mxu1 }
 0x1f5   :  { %v405_v43 = vadd.f32 %v604_v33, %v404_v42  ;;  %v828_v44 = vpack.c.bf16 %v474_v38, %v473_v39 }
 0x1f6   :  { %v476_v45 = vmax.f32 %v410_v41, 0.0 }
 0x1f7   :  { %v475_v46 = vmax.f32 %v405_v43, 0.0  ;;  %829 = vmatpush3.bf16.xpose.msra.mxu0 %v828_v44  ;;  %v740_v47 = vpop.f32.mrb[20].mxu1 }
 0x1f8   :  { %v420_v48 = vadd.f32 %v740_v47, %v604_v33  ;;  %v414_v49 = vpop.f32.mrb[21].mxu1  ;;  %830 = vmatprep.subr.bf16.mxu0 %v961_v29 }
 0x1f9   :  { %v831_v50 = vpack.c.bf16 %v476_v45, %v475_v46  ;;  %v415_v51 = vadd.f32 %v604_v33, %v414_v49 }
 0x1fa   :  { %v478_v52 = vmax.f32 %v420_v48, 0.0 }
 0x1fb   :  { %v477_v53 = vmax.f32 %v415_v51, 0.0  ;;  %v743_v54 = vpop.f32.mrb[22].mxu1 }
 0x1fc   :  { %v430_v55 = vadd.f32 %v743_v54, %v604_v33  ;;  %v424_v56 = vpop.f32.mrb[23].mxu1 }
 0x1fd   :  { %v834_v57 = vpack.c.bf16 %v478_v52, %v477_v53  ;;  %v425_v58 = vadd.f32 %v604_v33, %v424_v56 }
 0x1fe   :  { %v480_v59 = vmax.f32 %v430_v55, 0.0 }
 0x1ff   :  { %832 = vmatpush3.bf16.xpose.msra.mxu0 %v831_v50  ;;  %v479_v60 = vmax.f32 %v425_v58, 0.0  ;;  %v746_v61 = vpop.f32.mrb[24].mxu1 }
 0x200   :  { %833 = vmatprep.subr.bf16.mxu0 %v961_v29  ;;  %v440_v62 = vadd.f32 %v746_v61, %v604_v33  ;;  %v434_v63 = vpop.f32.mrb[25].mxu1 }
 0x201   :  { %v837_v0 = vpack.c.bf16 %v480_v59, %v479_v60  ;;  %v435_v1 = vadd.f32 %v604_v33, %v434_v63 }
 0x202   :  { %v482_v2 = vmax.f32 %v440_v62, 0.0 }
 0x203   :  { %v481_v3 = vmax.f32 %v435_v1, 0.0  ;;  %v749_v4 = vpop.f32.mrb[26].mxu1 }
 0x204   :  { %v450_v5 = vadd.f32 %v749_v4, %v604_v33  ;;  %v444_v6 = vpop.f32.mrb[27].mxu1 }
 0x205   :  { %v840_v7 = vpack.c.bf16 %v482_v2, %v481_v3  ;;  %v445_v8 = vadd.f32 %v604_v33, %v444_v6 }
 0x206   :  { %v484_v9 = vmax.f32 %v450_v5, 0.0 }
 0x207   :  { %835 = vmatpush3.bf16.xpose.msra.mxu0 %v834_v57  ;;  %v483_v10 = vmax.f32 %v445_v8, 0.0  ;;  %v752_v11 = vpop.f32.mrb[28].mxu1 }
 0x208   :  { %836 = vmatprep.subr.bf16.mxu0 %v961_v29  ;;  %v460_v12 = vadd.f32 %v752_v11, %v604_v33  ;;  %v454_v13 = vpop.f32.mrb[29].mxu1 }
 0x209   :  { %v843_v14 = vpack.c.bf16 %v484_v9, %v483_v10  ;;  %v455_v15 = vadd.f32 %v604_v33, %v454_v13 }
 0x20a   :  { %v486_v16 = vmax.f32 %v460_v12, 0.0 }
 0x20b   :  { %v485_v17 = vmax.f32 %v455_v15, 0.0  ;;  %v755_v18 = vpop.f32.mrb[30].mxu1 }
 0x20c   :  { %v470_v19 = vadd.f32 %v755_v18, %v604_v33  ;;  %v464_v20 = vpop.f32.mrb[31].mxu1 }
 0x20d   :  { %v846_v21 = vpack.c.bf16 %v486_v16, %v485_v17  ;;  %v465_v22 = vadd.f32 %v604_v33, %v464_v20 }
 0x20e   :  { %v488_v23 = vmax.f32 %v470_v19, 0.0 }
 0x20f   :  { %838 = vmatpush3.bf16.xpose.msra.mxu0 %v837_v0  ;;  %v487_v24 = vmax.f32 %v465_v22, 0.0 }
 0x210   :  { %839 = vmatprep.subr.bf16.mxu0 %v961_v29 }
 0x211   :  { %v849_v25 = vpack.c.bf16 %v488_v23, %v487_v24 }
 0x217   :  { %841 = vmatpush3.bf16.xpose.msra.mxu0 %v840_v7 }
 0x218   :  { %842 = vmatprep.subr.bf16.mxu0 %v961_v29 }
 0x21f   :  { %844 = vmatpush3.bf16.xpose.msra.mxu0 %v843_v14 }
 0x220   :  { %845 = vmatprep.subr.bf16.mxu0 %v961_v29 }
 0x227   :  { %847 = vmatpush3.bf16.xpose.msra.mxu0 %v846_v21 }
 0x228   :  { %848 = vmatprep.subr.bf16.mxu0 %v961_v29 }
 0x22f   :  { %850 = vmatpush3.bf16.xpose.msra.mxu0 %v849_v25 }
 0x236   :  { %789 = vmatmul.mubr.f32.vlgmr.msra.gmra.mrb[0].mxu0 %v489_v26 }
 0x309   :  { %v566_v33 = vpop.f32.mrb[0].mxu0 }
 0x30a   :  { %v567_v34 = vadd.f32 %v566_v33, %v499_v32  ;;  %v790_v35 = vpop.f32.mrb[1].mxu0 }
 0x30c   :  { %570 = vst [vmem:[#allocation9] sm:$0x1] %v567_v34 }
 0x30d   :  { %939 = shalt.err (!%p936_p0)
}
 0x30e   :  { %s940_s23 = scalar_lea.hbm %s1114_s7, 16 }
 0x30f   :  { %p941_p1 = scmp.ne.s32.totalorder %s1114_s7, %s940_s23  ;;  %p944_p2 = scmp.lt.u32.totalorder %s940_s23, %s1114_s7 }
 0x311   :  { %p946_p3 = pnand %p944_p2, %p941_p1 }
 0x313   :  { %949 = shalt.err (!%p946_p3)
}
 0x314   :  { %580 = dma.vmem_to_hbm [thread:$0]  %s578_s19, 16, %s1114_s7, [#allocation5]  }
 0x315   :  { %954 = dma.done.wait [#allocation5], 16  }
 0x316   :  { %955 = vsyncadd [#allocation5], 4294967280 }
 0x317   :  { %584 = vsyncpa [#allocation4], 1 }
 0x318   :  { %585 = vsyncpa [#allocation7], 1 }
 0x319   :  { %586 = vsyncpa [#allocation5], 1 }

</bundles_post_ra>
